<compile_context>
chip_gen: v7x
topology: tpu7x:2x2x1
jax: 0.10.0
libtpu: 0.0.40
codegen_flags: <defaults>
</compile_context>

<pallas_src>
import functools

import numpy as np
import jax
import jax.numpy as jnp
from jax.experimental import pallas as pl
from jax.experimental.pallas import tpu as pltpu


# ------------------------------ small helpers ------------------------------ #

def _round_up(x, m):
    return ((x + m - 1) // m) * m


def _token_tiling(t, cap=256):
    """Pick a token tile TM (multiple of 8, <= cap) and padded token count."""
    if t <= cap:
        tm = _round_up(t, 8)
        return tm, tm
    tm = cap
    return tm, _round_up(t, tm)


def _inter_tile(i_dim, cap=2048):
    """Largest 128-aligned divisor of I that is <= cap (or full I)."""
    if i_dim <= cap:
        return i_dim
    t = (cap // 128) * 128
    while t >= 128:
        if i_dim % t == 0:
            return t
        t -= 128
    # TODO(synk): pad the intermediate dim when it has no 128-aligned divisor.
    return i_dim


# ----------------------------- Pallas kernels ------------------------------ #

def _gate_softmax_kernel(x_ref, wgate_ref, gates_ref, *, num_experts, num_valid):
    x = x_ref[...].astype(jnp.float32)                       # gate.float()
    logits = jnp.dot(x, wgate_ref[...], preferred_element_type=jnp.float32)
    col = jax.lax.broadcasted_iota(jnp.int32, logits.shape, 1)
    adj = jnp.where(
        col >= 2 * num_experts, jnp.float32(-10.0),
        jnp.where(col >= num_experts, jnp.float32(-1.0), jnp.float32(0.0)))
    logits = logits + adj
    # mask lane-padding columns so they contribute 0 probability
    logits = jnp.where(col < num_valid, logits, jnp.float32(-1e30))
    m = jnp.max(logits, axis=-1, keepdims=True)
    e = jnp.exp(logits - m)
    gates_ref[...] = e / jnp.sum(e, axis=-1, keepdims=True)


def gate_softmax(x2d_pad, wgate_t, num_experts, num_valid, tm):
    """x2d_pad (T_pad, H); wgate_t (H, G).  Returns (T_pad, G_pad) f32 gates."""
    t_pad, h = x2d_pad.shape
    g_pad = _round_up(num_valid, 128)
    w_pad = jnp.pad(wgate_t, ((0, 0), (0, g_pad - num_valid)))
    n_t = t_pad // tm
    return pl.pallas_call(
        functools.partial(_gate_softmax_kernel,
                          num_experts=num_experts, num_valid=num_valid),
        out_shape=jax.ShapeDtypeStruct((t_pad, g_pad), jnp.float32),
        grid=(n_t,),
        in_specs=[
            pl.BlockSpec((tm, h), lambda i: (i, 0)),
            pl.BlockSpec((h, g_pad), lambda i: (0, 0)),
        ],
        out_specs=pl.BlockSpec((tm, g_pad), lambda i: (i, 0)),
        compiler_params=pltpu.CompilerParams(dimension_semantics=("parallel",)),
    )(x2d_pad, w_pad)


def _moe_experts_kernel(flags_ref, x_ref, wg_ref, wu_ref, wd_ref, cw_ref,
                        o_ref, acc_ref):
    i = pl.program_id(0)          # token tile
    e = pl.program_id(1)          # expert
    it = pl.program_id(2)         # intermediate tile

    @pl.when(jnp.logical_and(e == 0, it == 0))
    def _():
        acc_ref[...] = jnp.zeros_like(acc_ref)

    # Skip all compute when no token in this tile routed to this expert
    # (weight DMA still streams; full grouped routing is a larger rewrite).
    @pl.when(flags_ref[i, e] != 0)
    def _():
        x = x_ref[...]                                               # (TM, H)
        g = jnp.dot(x, wg_ref[...], preferred_element_type=jnp.float32)
        u = jnp.dot(x, wu_ref[...], preferred_element_type=jnp.float32)
        hmid = (g * jax.nn.sigmoid(g)) * u                           # f32 SwiGLU
        y = jnp.dot(hmid.astype(x.dtype), wd_ref[...],
                    preferred_element_type=jnp.float32)              # (TM, H) f32
        w = cw_ref[...].astype(jnp.float32)                          # (TM, 1)
        acc_ref[...] += y * w

    @pl.when(jnp.logical_and(e == pl.num_programs(1) - 1,
                             it == pl.num_programs(2) - 1))
    def _():
        o_ref[...] = acc_ref[...].astype(o_ref.dtype)


def moe_experts(x2d_pad, wg, wu, wd, comb, flags, *, tm, ti):
    """x2d_pad (T_pad,H); wg/wu (E,H,I); wd (E,I,H); comb (E,T_pad,1);
    flags (n_t, E) int32 -> (T_pad, H)."""
    t_pad, h = x2d_pad.shape
    e_num, _, i_dim = wg.shape
    n_t = t_pad // tm
    n_i = i_dim // ti

    x_b = jnp.dtype(x2d_pad.dtype).itemsize
    w_b = jnp.dtype(wg.dtype).itemsize
    o_b = x_b
    per_step = (tm * h * x_b            # x tile
                + 3 * h * ti * w_b      # wg/wu/wd tiles
                + tm * 4                # comb tile
                + tm * h * o_b)         # out tile
    est = 2 * per_step + tm * h * 4     # double-buffered inputs/outputs + f32 acc
    vmem_limit = int(min(max(2 * est, 32 * 1024 * 1024), 64 * 1024 * 1024))

    cost = pl.CostEstimate(
        flops=int(6 * t_pad * h * i_dim * e_num),
        transcendentals=int(t_pad * i_dim * e_num),
        bytes_accessed=int(n_t * e_num * 3 * h * i_dim * w_b
                           + t_pad * h * (x_b + o_b)
                           + e_num * t_pad * 4),
    )

    grid_spec = pltpu.PrefetchScalarGridSpec(
        num_scalar_prefetch=1,
        grid=(n_t, e_num, n_i),
        in_specs=[
            pl.BlockSpec((tm, h), lambda i, e, it, flg: (i, 0)),
            pl.BlockSpec((None, h, ti), lambda i, e, it, flg: (e, 0, it)),
            pl.BlockSpec((None, h, ti), lambda i, e, it, flg: (e, 0, it)),
            pl.BlockSpec((None, ti, h), lambda i, e, it, flg: (e, it, 0)),
            pl.BlockSpec((None, tm, 1), lambda i, e, it, flg: (e, i, 0)),
        ],
        out_specs=pl.BlockSpec((tm, h), lambda i, e, it, flg: (i, 0)),
        scratch_shapes=[pltpu.VMEM((tm, h), jnp.float32)],
    )
    return pl.pallas_call(
        _moe_experts_kernel,
        out_shape=jax.ShapeDtypeStruct((t_pad, h), x2d_pad.dtype),
        grid_spec=grid_spec,
        compiler_params=pltpu.CompilerParams(
            dimension_semantics=("parallel", "arbitrary", "arbitrary"),
            vmem_limit_bytes=vmem_limit),
        cost_estimate=cost,
    )(flags, x2d_pad, wg, wu, wd, comb)


# ------------------------------ forward pass ------------------------------- #

def tcmoe_block_forward(hidden_states, params, *, num_experts, top_k,
                        num_null_experts):
    b, s, h = hidden_states.shape
    t = b * s
    e_num = num_experts
    x2d = hidden_states.reshape(t, h)

    # token tiling shared by both kernels
    tm, t_pad = _token_tiling(t)
    n_t = t_pad // tm
    x_pad = jnp.pad(x2d, ((0, t_pad - t), (0, 0))) if t_pad != t else x2d

    # --- gating (Pallas kernel 1, lane-padded softmax) ---
    g_valid = 2 * e_num + num_null_experts
    gates_full = gate_softmax(x_pad, params["gate_wT"], e_num, g_valid, tm)
    gates = gates_full[:t, :g_valid]                          # (T, 2E+NN) f32

    # --- top-k routing + renormalization (plain-JAX glue) ---
    # TODO(synk): top-k selection / gather kept in plain JAX (no clean Pallas top-k).
    weights, selected = jax.lax.top_k(gates, top_k)
    non_null = (selected < 2 * e_num).astype(jnp.float32)
    wsum_non_null = jnp.sum(weights * non_null, axis=1, keepdims=True)
    wsum_null = jnp.sum(gates[:, 2 * e_num:], axis=1, keepdims=True)
    gates_r = gates / (wsum_non_null + wsum_null)
    weights_r = jnp.take_along_axis(gates_r, selected, axis=1)    # (T, k)

    # Dense per-token weight over the 2E "directional" experts; null-expert
    # selections (index >= 2E) one-hot to all-zeros => contribute nothing.
    onehot = jax.nn.one_hot(selected, 2 * e_num, dtype=jnp.float32)   # (T,k,2E)
    dense_w = jnp.einsum("tk,tke->te", weights_r, onehot)             # (T, 2E)
    comb = (dense_w[:, :e_num] + dense_w[:, e_num:]).astype(hidden_states.dtype)
    comb = jnp.transpose(comb)                                        # (E, T)
    if t_pad != t:
        comb = jnp.pad(comb, ((0, 0), (0, t_pad - t)))
    # (token_tile, expert) activity flags for pl.when compute gating
    flags = (jnp.max(jnp.abs(comb).reshape(e_num, n_t, tm), axis=-1) > 0)
    flags = jnp.transpose(flags).astype(jnp.int32)                    # (n_t, E)
    comb3 = comb.reshape(e_num, t_pad, 1)

    # --- expert MLPs + weighted accumulation (Pallas kernel 2, hot path) ---
    ti = _inter_tile(params["w_gate"].shape[2])
    out2d = moe_experts(x_pad, params["w_gate"], params["w_up"],
                        params["w_down"], comb3, flags, tm=tm, ti=ti)
    return out2d[:t].reshape(b, s, h)


# ------------------------- deterministic parameters ------------------------ #

def init_params(key, hidden, inter, num_experts, num_null_experts,
                dtype=jnp.float32):
    # Production would use bf16 expert weights; f32 here for the tight self-test.
    ks = jax.random.split(key, 4)
    g = 2 * num_experts + num_null_experts
    return {
        "gate_wT": 0.05 * jax.random.normal(ks[0], (hidden, g), jnp.float32),
        "w_gate":  (0.05 * jax.random.normal(
            ks[1], (num_experts, hidden, inter), jnp.float32)).astype(dtype),
        "w_up":    (0.05 * jax.random.normal(
            ks[2], (num_experts, hidden, inter), jnp.float32)).astype(dtype),
        "w_down":  (0.05 * jax.random.normal(
            ks[3], (num_experts, inter, hidden), jnp.float32)).astype(dtype),
    }


# ---------------------- PyTorch-faithful numpy reference -------------------- #

def reference_forward(hidden_states, params, num_experts, top_k, num_null_experts):
    x = np.asarray(hidden_states, np.float32)
    b, s, h = x.shape
    t = b * s
    e_num = num_experts
    x2d = x.reshape(t, h)

    logits = x2d @ np.asarray(params["gate_wT"], np.float32)
    logits[:, 2 * e_num:] -= 10.0
    logits[:, e_num:2 * e_num] -= 1.0
    ex = np.exp(logits - logits.max(axis=1, keepdims=True))
    gates = ex / ex.sum(axis=1, keepdims=True)

    # same top-k as the kernel path (tie-break consistency)
    w_j, sel_j = jax.lax.top_k(jnp.asarray(gates), top_k)
    weights = np.asarray(w_j)
    selected = np.asarray(sel_j)

    non_null = (selected < 2 * e_num).astype(np.float32)
    wsum = (weights * non_null).sum(1, keepdims=True) + \
        gates[:, 2 * e_num:].sum(1, keepdims=True)
    gates_r = gates / wsum
    weights_r = np.take_along_axis(gates_r, selected, axis=1)

    wg = np.asarray(params["w_gate"], np.float32)
    wu = np.asarray(params["w_up"], np.float32)
    wd = np.asarray(params["w_down"], np.float32)

    final = np.zeros((t, h), np.float32)
    for e_idx in range(2 * e_num):
        phys = e_idx if e_idx < e_num else e_idx - e_num
        top_x, idx = np.nonzero(selected == e_idx)
        if top_x.size == 0:
            continue
        cs = x2d[top_x]
        g = cs @ wg[phys]
        u = cs @ wu[phys]
        hh = (g * (1.0 / (1.0 + np.exp(-g)))) * u
        y = hh @ wd[phys]
        cur = y * weights_r[top_x, idx][:, None]
        np.add.at(final, top_x, cur)
    return final.reshape(b, s, h)


# ----------------------------------- main ----------------------------------- #

if __name__ == "__main__":
    BATCH, SEQ, HIDDEN, INTER = 2, 8, 32, 64
    NUM_EXPERTS, TOP_K, NUM_NULL = 4, 2, 1

    key = jax.random.PRNGKey(0)
    kx, kp = jax.random.split(key)
    x = jax.random.normal(kx, (BATCH, SEQ, HIDDEN), jnp.float32)
    params = init_params(kp, HIDDEN, INTER, NUM_EXPERTS, NUM_NULL)

    out = tcmoe_block_forward(x, params, num_experts=NUM_EXPERTS,
                              top_k=TOP_K, num_null_experts=NUM_NULL)
    out = jax.block_until_ready(out)

    ref = reference_forward(x, params, NUM_EXPERTS, TOP_K, NUM_NULL)
    np.testing.assert_allclose(np.asarray(out), ref, rtol=2e-5, atol=2e-5)
    print("KERNEL_OK")
</pallas_src>

<mosaic_0001>
module attributes {stable_mosaic.version = 11 : i64} {
  func.func @_gate_softmax_kernel(%arg0: i32, %arg1: memref<16x32xf32, #tpu.memory_space<vmem>>, %arg2: memref<32x128xf32, #tpu.memory_space<vmem>>, %arg3: memref<16x128xf32, #tpu.memory_space<vmem>>) attributes {dimension_semantics = [#tpu.dimension_semantics<parallel>], iteration_bounds = array<i64: 1>, scalar_prefetch = 0 : i64, scratch_operands = 0 : i64, tpu.core_type = #tpu.core_type<tc>, window_params = [{transform_indices = @transform_0, window_bounds = array<i64: 16, 32>}, {pipeline_mode = #tpu.pipeline_mode<synchronous>, transform_indices = @transform_1, window_bounds = array<i64: 32, 128>}, {transform_indices = @transform_2, window_bounds = array<i64: 16, 128>}]} {
    %c0 = arith.constant 0 : index
    %c0_0 = arith.constant 0 : index
    %0 = vector.load %arg1[%c0, %c0_0] : memref<16x32xf32, #tpu.memory_space<vmem>>, vector<16x32xf32>
    %c0_1 = arith.constant 0 : index
    %c0_2 = arith.constant 0 : index
    %1 = vector.load %arg2[%c0_1, %c0_2] : memref<32x128xf32, #tpu.memory_space<vmem>>, vector<32x128xf32>
    %cst = arith.constant dense<0.000000e+00> : vector<16x128xf32>
    %2 = tpu.matmul %0, %1, %cst {dimension_numbers = #tpu.dot_dimension_numbers<[1], [0], [0], [1], [0, 0, 1, 1], [], []>} : vector<16x32xf32>, vector<32x128xf32>, vector<16x128xf32> -> vector<16x128xf32>
    %3 = tpu.iota {dimensions = array<i32: 1>} : vector<16x128xi32>
    %c8_i32 = arith.constant 8 : i32
    %4 = vector.broadcast %c8_i32 : i32 to vector<16x128xi32>
    %5 = arith.cmpi sge, %3, %4 : vector<16x128xi32>
    %c4_i32 = arith.constant 4 : i32
    %6 = vector.broadcast %c4_i32 : i32 to vector<16x128xi32>
    %7 = arith.cmpi sge, %3, %6 : vector<16x128xi32>
    %cst_3 = arith.constant -1.000000e+00 : f32
    %cst_4 = arith.constant 0.000000e+00 : f32
    %8 = vector.broadcast %cst_3 : f32 to vector<16x128xf32>
    %9 = vector.broadcast %cst_4 : f32 to vector<16x128xf32>
    %10 = arith.select %7, %8, %9 : vector<16x128xi1>, vector<16x128xf32>
    %cst_5 = arith.constant -1.000000e+01 : f32
    %11 = vector.broadcast %cst_5 : f32 to vector<16x128xf32>
    %12 = arith.select %5, %11, %10 : vector<16x128xi1>, vector<16x128xf32>
    %13 = arith.addf %2, %12 : vector<16x128xf32>
    %c9_i32 = arith.constant 9 : i32
    %14 = vector.broadcast %c9_i32 : i32 to vector<16x128xi32>
    %15 = arith.cmpi slt, %3, %14 : vector<16x128xi32>
    %cst_6 = arith.constant -1.000000e+30 : f32
    %16 = vector.broadcast %cst_6 : f32 to vector<16x128xf32>
    %17 = arith.select %15, %13, %16 : vector<16x128xi1>, vector<16x128xf32>
    %cst_7 = arith.constant dense<0xFF800000> : vector<16xf32>
    %18 = vector.multi_reduction <maximumf>, %17, %cst_7 [1] : vector<16x128xf32> to vector<16xf32>
    %19 = vector.shape_cast %18 : vector<16xf32> to vector<16x1xf32>
    %20 = vector.broadcast %19 : vector<16x1xf32> to vector<16x128xf32>
    %21 = arith.subf %17, %20 : vector<16x128xf32>
    %22 = math.exp %21 : vector<16x128xf32>
    %cst_8 = arith.constant dense<0.000000e+00> : vector<16xf32>
    %23 = vector.multi_reduction <add>, %22, %cst_8 [1] : vector<16x128xf32> to vector<16xf32>
    %24 = vector.shape_cast %23 : vector<16xf32> to vector<16x1xf32>
    %25 = vector.broadcast %24 : vector<16x1xf32> to vector<16x128xf32>
    %26 = arith.divf %22, %25 : vector<16x128xf32>
    %c0_9 = arith.constant 0 : index
    %c0_10 = arith.constant 0 : index
    %27 = vector.load %arg3[%c0_9, %c0_10] : memref<16x128xf32, #tpu.memory_space<vmem>>, vector<16x128xf32>
    tpu.vector_store %arg3[%c0_9, %c0_10], %26 {strides = array<i32>} : memref<16x128xf32, #tpu.memory_space<vmem>>, vector<16x128xf32>,
    return
  }
  func.func @transform_0(%arg0: i32) -> (i32, i32) {
    %c0_i32 = arith.constant 0 : i32
    %c0_i32_0 = arith.constant 0 : i32
    return %arg0, %c0_i32 : i32, i32
  }
  func.func @transform_1(%arg0: i32) -> (i32, i32) {
    %c0_i32 = arith.constant 0 : i32
    %c0_i32_0 = arith.constant 0 : i32
    %c0_i32_1 = arith.constant 0 : i32
    return %c0_i32, %c0_i32_0 : i32, i32
  }
  func.func @transform_2(%arg0: i32) -> (i32, i32) {
    %c0_i32 = arith.constant 0 : i32
    %c0_i32_0 = arith.constant 0 : i32
    return %arg0, %c0_i32 : i32, i32
  }
}

</mosaic_0001>

<bundles_post_ra>
// kernel: tpu_custom_call.1
= control target key start
LH: loop header
LB: loop body
LE: loop exit
PB: predicated region body
PF: predicated region fallthrough
CT: control target
= control target key end

     0   :  { %7 = vsyncpa [#allocation3], 0  ;;  %s354_s0 = inlined_call_operand.hbm [shape: f32[16,32], index: 0, kind: input, shape index: {}]   ;;  %s355_s1 = inlined_call_operand.hbm [shape: f32[32,128], index: 1, kind: input, shape index: {}]   ;;  %s356_s2 = inlined_call_operand.hbm [shape: f32[16,128], index: 2, kind: output, shape index: {}]  }
   0x1   :  { %8 = vsyncpa [#allocation6], 0 }
   0x2   :  { %9 = vsyncpa [#allocation4], 0  ;;  %s288_s9 = smov [#allocation2]   ;;  %s216_s13 = scalar_lea.hbm %s354_s0, 256 }
   0x3   :  { %s15_s10 = sshll.u32 %s288_s9, 4  ;;  %p217_p0 = scmp.ne.s32.totalorder %s354_s0, %s216_s13  ;;  %s16_s10 = int_to_ptr.vmem [resolvable:$true] %s15_s10 }
   0x4   :  { %p220_p1 = scmp.lt.u32.totalorder %s216_s13, %s354_s0 }
   0x6   :  { %p222_p2 = pnand %p220_p1, %p217_p0 }
   0x8   :  { %225 = shalt.err (!%p222_p2)
}
   0x9   :  { %s226_s18 = scalar_lea.vmem %s16_s10, 256  ;;  %p231_p4 = scmp.lt.s32.totalorder %s16_s10, %s16_s10 }
   0xa   :  { %p227_p3 = scmp.ne.s32.totalorder %s16_s10, %s226_s18  ;;  %p232_p5 = scmp.lt.s32.totalorder %s226_s18, %s226_s18 }
   0xc   :  { %p233_p6 = por %p232_p5, %p231_p4 }
   0xe   :  { %p234_p7 = pnand %p233_p6, %p227_p3 }
  0x10   :  { %237 = shalt.err (!%p234_p7)
}
  0x11   :  { %s289_s19 = smov 128   ;;  %s290_s20 = smov 8  }
  0x12   :  { %21 = dma.hbm_to_vmem [thread:$0]  %s354_s0, 256, %s16_s10, [#allocation3], %s289_s19, %s289_s19, %s290_s20  }
  0x13   :  { %s291_s23 = smov [#allocation5]   ;;  %s238_s27 = scalar_lea.hbm %s355_s1, 512 }
  0x14   :  { %s27_s24 = sshll.u32 %s291_s23, 4  ;;  %p239_p8 = scmp.ne.s32.totalorder %s355_s1, %s238_s27  ;;  %s28_s24 = int_to_ptr.vmem [resolvable:$true] %s27_s24 }
  0x15   :  { %p242_p9 = scmp.lt.u32.totalorder %s238_s27, %s355_s1 }
  0x17   :  { %p244_p10 = pnand %p242_p9, %p239_p8 }
  0x19   :  { %247 = shalt.err (!%p244_p10)
}
  0x1a   :  { %s248_s4 = scalar_lea.vmem %s28_s24, 512  ;;  %p253_p12 = scmp.lt.s32.totalorder %s28_s24, %s28_s24 }
  0x1b   :  { %p249_p11 = scmp.ne.s32.totalorder %s28_s24, %s248_s4  ;;  %p254_p13 = scmp.lt.s32.totalorder %s248_s4, %s248_s4 }
  0x1d   :  { %p255_p0 = por %p254_p13, %p253_p12 }
  0x1f   :  { %p256_p1 = pnand %p255_p0, %p249_p11 }
  0x21   :  { %259 = shalt.err (!%p256_p1)
}
  0x22   :  { %33 = dma.hbm_to_vmem [thread:$0]  %s355_s1, 512, %s28_s24, [#allocation6], %s289_s19, %s289_s19, %s290_s20  }
  0x23   :  { %282 = dma.done.wait [#allocation3], 256  }
  0x24   :  { %283 = vsyncadd [#allocation3], 4294967040 }
  0x25   :  { %284 = dma.done.wait [#allocation6], 512  }
  0x26   :  { %285 = vsyncadd [#allocation6], 4294966784  ;;  %vm52_vm0 = vcmask 261120   ;;  %v42_v0 = vld [vmem:[#allocation5] sm:$0xff]  ;;  %v43_v1 = vld [vmem:[#allocation5 + $0x8] sm:$0xff]  ;;  %v46_v8 = vlaneseq  ;;  %v292_v10 = vmov 0.0  }
  0x27   :  { %v44_v2 = vld [vmem:[#allocation5 + $0x10] sm:$0xff]  ;;  %v194_v3 = vpack.c.bf16 %v43_v1, %v42_v0  ;;  %v45_v4 = vld [vmem:[#allocation5 + $0x18] sm:$0xff]  ;;  %s293_s1 = smov [#allocation7]  }
  0x28   :  { %v40_v5 = vld [vmem:[#allocation2] sm:$0xff]  ;;  %v198_v6 = vpack.c.bf16 %v45_v4, %v44_v2  ;;  %v41_v7 = vld [vmem:[#allocation2 + $0x8] sm:$0xff]  ;;  %v47_v9 = vand.u32 127, %v46_v8  ;;  %s162_s6 = sshll.u32 %s293_s1, 4  ;;  %s163_s6 = int_to_ptr.vmem [resolvable:$true] %s162_s6 }
  0x29   :  { %191 = vmatprep.mubr.msk.f32.mxu0 %vm52_vm0, %v40_v5  ;;  %195 = vmatprep.subr.bf16.mxu0 %v194_v3  ;;  %s260_s7 = scalar_lea.vmem %s163_s6, 256  ;;  %p265_p3 = scmp.lt.s32.totalorder %s163_s6, %s163_s6 }
  0x2a   :  { %197 = vmatpush3.bf16.msra.mxu0 %v194_v3  ;;  %vm49_vm1 = vcmp.ge.s32.totalorder %v47_v9, 4  ;;  %vm48_vm2 = vcmp.ge.s32.totalorder %v47_v9, 8  ;;  %vm134_vm3 = vcmp.lt.s32.totalorder %v47_v9, 9  ;;  %p261_p2 = scmp.ne.s32.totalorder %s163_s6, %s260_s7  ;;  %p266_p4 = scmp.lt.s32.totalorder %s260_s7, %s260_s7 }
  0x2b   :  { %199 = vmatprep.subr.bf16.mxu0 %v198_v6  ;;  %v50_v11 = vsel %vm49_vm1, -1.0, %v292_v10 }
  0x2c   :  { %v51_v12 = vsel %vm48_vm2, -10.0, %v50_v11  ;;  %p267_p5 = por %p266_p4, %p265_p3 }
  0x2e   :  { %201 = vmatpush3.bf16.msra.mxu0 %v198_v6  ;;  %p268_p6 = pnand %p267_p5, %p261_p2 }
  0x31   :  { %192 = vmatmul.mubr.msk.f32.vlgmr.msra.gmra.mrb[0].mxu0 %vm52_vm0, %v41_v7 }
 0x104   :  { %v193_v13 = vpop.f32.mrb[0].mxu0 }
 0x105   :  { %v125_v14 = vpop.f32.mrb[1].mxu0  ;;  %v131_v16 = vadd.f32 %v193_v13, %v51_v12 }
 0x106   :  { %v126_v15 = vadd.f32 %v125_v14, %v51_v12 }
 0x107   :  { %v136_v18 = vsel %vm134_vm3, %v131_v16, -1e+30 }
 0x108   :  { %v135_v17 = vsel %vm134_vm3, %v126_v15, -1e+30 }
 0x109   :  { %137 = vmax.xlane.f32.xlu0 %v135_v17 }
 0x10d   :  { %139 = vmax.xlane.f32.xlu0 %v136_v18 }
 0x196   :  { %v138_v19 = vpop.xlane.xlu0 %137 }
 0x197   :  { %v141_v20 = vsub.f32 %v135_v17, %v138_v19 }
 0x199   :  { %v143_v21 = vmul.f32 1.442695, %v141_v20 }
 0x19a   :  { %v140_v22 = vpop.xlane.xlu0 %139 }
 0x19b   :  { %208 = vpow2.f32 %v143_v21  ;;  %v142_v23 = vsub.f32 %v136_v18, %v140_v22 }
 0x19d   :  { %v145_v24 = vmul.f32 1.442695, %v142_v23 }
 0x19f   :  { %210 = vpow2.f32 %v145_v24 }
 0x1a5   :  { %v209_v25 = vpop.eup %208 }
 0x1a6   :  { %147 = vadd.xlane.f32.xlu1 %v209_v25 }
 0x1a9   :  { %v211_v26 = vpop.eup %210 }
 0x1aa   :  { %149 = vadd.xlane.f32.xlu1 %v211_v26 }
 0x233   :  { %v148_v27 = vpop.xlane.xlu1 %147 }
 0x234   :  { %212 = vrcp.f32 %v148_v27 }
 0x237   :  { %v150_v28 = vpop.xlane.xlu1 %149 }
 0x238   :  { %214 = vrcp.f32 %v150_v28 }
 0x23e   :  { %v213_v29 = vpop.eup %212 }
 0x23f   :  { %v152_v30 = vmul.f32 %v213_v29, %v209_v25 }
 0x241   :  { %155 = vst [vmem:[#allocation7] sm:$0xff] %v152_v30 }
 0x242   :  { %v215_v31 = vpop.eup %214 }
 0x243   :  { %v154_v32 = vmul.f32 %v215_v31, %v211_v26 }
 0x245   :  { %156 = vst [vmem:[#allocation7 + $0x8] sm:$0xff] %v154_v32 }
 0x246   :  { %271 = shalt.err (!%p268_p6)
}
 0x247   :  { %s272_s10 = scalar_lea.hbm %s356_s2, 256 }
 0x248   :  { %p273_p7 = scmp.ne.s32.totalorder %s356_s2, %s272_s10  ;;  %p276_p8 = scmp.lt.u32.totalorder %s272_s10, %s356_s2 }
 0x24a   :  { %p278_p9 = pnand %p276_p8, %p273_p7 }
 0x24c   :  { %281 = shalt.err (!%p278_p9)
}
 0x24d   :  { %168 = dma.vmem_to_hbm [thread:$0]  %s163_s6, 256, %s356_s2, [#allocation4], %s289_s19, %s289_s19, %s290_s20  }
 0x24e   :  { %286 = dma.done.wait [#allocation4], 256  }
 0x24f   :  { %287 = vsyncadd [#allocation4], 4294967040 }
 0x250   :  { %172 = vsyncpa [#allocation3], 1 }
 0x251   :  { %173 = vsyncpa [#allocation6], 1 }
 0x252   :  { %174 = vsyncpa [#allocation4], 1 }

</bundles_post_ra>
